<compile_context>
chip_gen: v7x
topology: tpu7x:2x2x1
jax: 0.10.0
libtpu: 0.0.40
codegen_flags: <defaults>
</compile_context>

<pallas_src>
import functools

import jax
import jax.numpy as jnp
from jax import lax
from jax.experimental import pallas as pl
from jax.experimental.pallas import tpu as pltpu


_DIRECT_PATH_MAX_K = 8        # at/below this kernel_size the unrolled roll+add path wins
_LANE = 128                   # TPU lane width: channels padded to a multiple of this
_MAX_BATCH_TILE = 8           # cap on batch rows folded into one grid step
_TARGET_TILE_BYTES = 1 << 20  # ~1 MB per input tile (HBM-roofline sweet spot)


def _shift_down_zero(arr, shift, row_idx):
    """arr shifted towards higher row indices by `shift`, zero-filled at the top.

    XLU rotation (pltpu.roll) + VALU select — no full-block VMEM copy.
    rolled[i] = arr[i - shift (mod L)]; rows i < shift are zeroed.
    """
    rolled = pltpu.roll(arr, shift=shift, axis=0)
    return jnp.where(row_idx >= shift, rolled, 0.0)


def _window_means(xf, kernel_size, pad, row_idx):
    """Stride-1 replication-padded moving averages for one (L, C) f32 slab.

    Row p of the result holds the mean of the window starting at padded position p;
    rows past the number of valid window positions are ignored by the caller.
    Replication padding is folded analytically, so no padded buffer is built.
    """
    L, C = xf.shape
    d_up = kernel_size - 1 - pad          # window-end offset w.r.t. unpadded index p
    d_lo = pad + 1                        # prefix-sum "lower" offset

    x_first = jnp.broadcast_to(lax.slice_in_dim(xf, 0, 1, axis=0), (L, C))
    x_last = jnp.broadcast_to(lax.slice_in_dim(xf, L - 1, L, axis=0), (L, C))

    if kernel_size <= _DIRECT_PATH_MAX_K:
        # Direct path: (k-1) in-register rotations (XLU) + masked adds (VALU).
        middle = xf
        for j in range(kernel_size):
            e = j - pad
            if e == 0:
                continue
            if -L < e < L:
                rolled = pltpu.roll(xf, shift=(-e) % L, axis=0)    # rolled[p] = xf[p + e]
                valid = (row_idx >= -e) & (row_idx <= (L - 1 - e))
                middle = middle + jnp.where(valid, rolled, 0.0)
            # |e| >= L: that window element is always clamped -> handled by edge counts.
    else:
        # Prefix-sum path (DLinear k=25): Hillis–Steele inclusive scan over the
        # UNPADDED block (log2(L) roll+select+add), then one difference.
        P = xf
        shift = 1
        while shift < L:                                           # static Python loop
            P = P + _shift_down_zero(P, shift, row_idx)
            shift *= 2
        p_total = jnp.broadcast_to(lax.slice_in_dim(P, L - 1, L, axis=0), (L, C))

        # upper[p] = P[min(p + d_up, L - 1)]
        if d_up == 0:
            upper = P
        elif d_up <= L - 1:
            up_roll = pltpu.roll(P, shift=(L - d_up) % L, axis=0)  # = P[(p + d_up) mod L]
            upper = jnp.where(row_idx <= (L - 1 - d_up), up_roll, p_total)
        else:
            upper = p_total

        # lower[p] = P[p - d_lo] for p >= d_lo, else 0  (i.e. P[-1] = 0 convention)
        if d_lo <= L - 1:
            lower = _shift_down_zero(P, d_lo, row_idx)
        else:
            lower = jnp.zeros_like(P)
        middle = upper - lower

    # Replication padding folded analytically: window slots that fall before index 0
    # contribute x[0], slots past L-1 contribute x[L-1].
    n_front = jnp.maximum(pad - row_idx, 0).astype(jnp.float32)                     # (L, 1)
    n_back = jnp.maximum(row_idx + (kernel_size - pad - L), 0).astype(jnp.float32)  # (L, 1)
    sums = middle + n_front * x_first + n_back * x_last
    return sums * (1.0 / kernel_size)


def _moving_avg_kernel(x_ref, o_ref, *scratch, kernel_size, stride, pad, out_len):
    # x_ref: (BT, L, C) un-padded input rows for this grid step
    # o_ref: (BT, out_len, C)
    BT, L, _ = x_ref.shape
    row_idx = lax.broadcasted_iota(jnp.int32, (L, 1), 0)      # hoisted once per grid step

    for bt in range(BT):                                       # BT small; static unroll
        xf = x_ref[bt].astype(jnp.float32)                     # (L, C) slab, f32 accumulate
        means = _window_means(xf, kernel_size, pad, row_idx)   # (L, C) stride-1 means
        if stride == 1:
            if out_len != L:
                means = lax.slice_in_dim(means, 0, out_len, axis=0)   # start-0 slice
            o_ref[bt] = means.astype(o_ref.dtype)
        else:
            # Subsample stride-1 means with a strided VMEM read (no MXU micro-matmul).
            acc_scratch = scratch[0]
            acc_scratch[...] = means
            o_ref[bt] = acc_scratch[pl.ds(0, out_len, stride=stride), :].astype(o_ref.dtype)


def _round_up(n, m):
    return ((n + m - 1) // m) * m


def _pick_batch_tile(B, bytes_per_batch):
    """Largest divisor of B that keeps the input tile near ~1 MB, keeps the grid
    length >= 2 when B >= 2 (both v7x TensorCores busy), and bounds unrolling."""
    cap = B if B < 2 else max(1, B // 2)
    cap = min(cap, _MAX_BATCH_TILE)
    best = 1
    for d in range(1, B + 1):
        if B % d == 0 and d <= cap and d * bytes_per_batch <= _TARGET_TILE_BYTES:
            best = d
    return best


def make_moving_avg(kernel_size, stride, B, L, C, dtype=jnp.float32):
    """Returns forward(x) with x: (B, L, C) -> (B, out_len, C), matching PyTorch moving_avg."""
    pad = (kernel_size - 1) // 2
    L_pad = L + 2 * pad
    assert L_pad >= kernel_size, "sequence too short for this kernel_size"
    out_len = (L_pad - kernel_size) // stride + 1

    # Lane-dense channels: pad C up to a multiple of 128 so stores are unmasked vst.
    Cp = _round_up(max(C, 1), _LANE)

    bytes_per_batch = L * Cp * jnp.dtype(dtype).itemsize
    BT = _pick_batch_tile(B, bytes_per_batch)
    grid = (B // BT,)

    kernel = functools.partial(
        _moving_avg_kernel,
        kernel_size=kernel_size, stride=stride, pad=pad, out_len=out_len)

    scratch_shapes = []
    if stride > 1:
        scratch_shapes = [pltpu.VMEM((L, Cp), jnp.float32)]

    grid_spec = pltpu.PrefetchScalarGridSpec(
        num_scalar_prefetch=0,
        grid=grid,
        in_specs=[pl.BlockSpec((BT, L, Cp), lambda b: (b, 0, 0))],
        out_specs=pl.BlockSpec((BT, out_len, Cp), lambda b: (b, 0, 0)),
        scratch_shapes=scratch_shapes,
    )

    call = pl.pallas_call(
        kernel,
        out_shape=jax.ShapeDtypeStruct((B, out_len, Cp), dtype),
        grid_spec=grid_spec,
        compiler_params=pltpu.CompilerParams(
            dimension_semantics=("parallel",),        # batch steps independent
            vmem_limit_bytes=32 * 1024 * 1024,        # safe on v5e/v6e/v7x
        ),
    )

    def forward(x):
        assert x.shape == (B, L, C), (x.shape, (B, L, C))
        if Cp != C:
            x = jnp.pad(x, ((0, 0), (0, 0), (0, Cp - C)))
        y = call(x)
        if Cp != C:
            y = y[:, :, :C]
        return y

    return forward


def _reference_moving_avg(x, kernel_size, stride):
    # Pure-JAX reference mirroring the PyTorch module exactly.
    pad = (kernel_size - 1) // 2
    front = jnp.repeat(x[:, 0:1, :], pad, axis=1)
    end = jnp.repeat(x[:, -1:, :], pad, axis=1)
    xp = jnp.concatenate([front, x, end], axis=1)  # (B, L_pad, C)
    L_pad = xp.shape[1]
    out_len = (L_pad - kernel_size) // stride + 1
    cols = [xp[:, t * stride: t * stride + kernel_size, :].mean(axis=1)
            for t in range(out_len)]
    return jnp.stack(cols, axis=1)


if __name__ == "__main__":
    key = jax.random.PRNGKey(0)

    # (B, L, C, kernel_size, stride)
    cases = [
        (2, 96, 128, 25, 1),   # DLinear default k=25 -> prefix-sum path, lane-dense C
        (2, 96, 7, 25, 1),     # real DLinear channel count -> wrapper pads C to 128
        (4, 64, 128, 5, 1),    # small k -> direct roll+add path, batch tile BT=2
        (2, 32, 128, 4, 2),    # even k + stride>1 -> strided VMEM-scratch subsample
    ]

    for idx, (B, L, C, k, s) in enumerate(cases):
        key, sub = jax.random.split(key)
        x = jax.random.normal(sub, (B, L, C), dtype=jnp.float32)

        fwd = make_moving_avg(k, s, B, L, C, dtype=x.dtype)
        out = jax.block_until_ready(fwd(x))

        ref = _reference_moving_avg(x, k, s)
        assert out.shape == ref.shape, (idx, out.shape, ref.shape)
        assert jnp.allclose(out, ref, atol=1e-4, rtol=1e-4), f"mismatch in case {idx}"

    print("KERNEL_OK")
</pallas_src>

<mosaic_0001>
module attributes {stable_mosaic.version = 11 : i64} {
  func.func @_moving_avg_kernel(%arg0: i32, %arg1: memref<1x96x128xf32, #tpu.memory_space<vmem>>, %arg2: memref<1x96x128xf32, #tpu.memory_space<vmem>>) attributes {dimension_semantics = [#tpu.dimension_semantics<parallel>], iteration_bounds = array<i64: 2>, scalar_prefetch = 0 : i64, scratch_operands = 0 : i64, tpu.core_type = #tpu.core_type<tc>, window_params = [{transform_indices = @transform_0, window_bounds = array<i64: 1, 96, 128>}, {transform_indices = @transform_1, window_bounds = array<i64: 1, 96, 128>}]} {
    %0 = tpu.iota {dimensions = array<i32: 0>} : vector<96x1xi32>
    %c0 = arith.constant 0 : index
    %c0_0 = arith.constant 0 : index
    %c0_1 = arith.constant 0 : index
    %1 = vector.load %arg1[%c0, %c0_0, %c0_1] : memref<1x96x128xf32, #tpu.memory_space<vmem>>, vector<1x96x128xf32>
    %2 = vector.shape_cast %1 : vector<1x96x128xf32> to vector<96x128xf32>
    %3 = vector.extract_strided_slice %2 {offsets = [0, 0], sizes = [1, 128], strides = [1, 1]} : vector<96x128xf32> to vector<1x128xf32>
    %4 = vector.shape_cast %3 : vector<1x128xf32> to vector<1x128xf32>
    %5 = vector.broadcast %4 : vector<1x128xf32> to vector<96x128xf32>
    %6 = vector.extract_strided_slice %2 {offsets = [95, 0], sizes = [1, 128], strides = [1, 1]} : vector<96x128xf32> to vector<1x128xf32>
    %7 = vector.shape_cast %6 : vector<1x128xf32> to vector<1x128xf32>
    %8 = vector.broadcast %7 : vector<1x128xf32> to vector<96x128xf32>
    %c1_i32 = arith.constant 1 : i32
    %9 = tpu.dynamic_rotate %2 by %c1_i32 dim 0 : vector<96x128xf32>, i32 -> vector<96x128xf32>
    %c1_i32_2 = arith.constant 1 : i32
    %10 = vector.broadcast %c1_i32_2 : i32 to vector<96x1xi32>
    %11 = arith.cmpi sge, %0, %10 : vector<96x1xi32>
    %cst = arith.constant 0.000000e+00 : f32
    %12 = vector.shape_cast %11 : vector<96x1xi1> to vector<96x1xi1>
    %13 = vector.broadcast %12 : vector<96x1xi1> to vector<96x128xi1>
    %14 = vector.broadcast %cst : f32 to vector<96x128xf32>
    %15 = arith.select %13, %9, %14 : vector<96x128xi1>, vector<96x128xf32>
    %16 = arith.addf %2, %15 : vector<96x128xf32>
    %c2_i32 = arith.constant 2 : i32
    %17 = tpu.dynamic_rotate %16 by %c2_i32 dim 0 : vector<96x128xf32>, i32 -> vector<96x128xf32>
    %c2_i32_3 = arith.constant 2 : i32
    %18 = vector.broadcast %c2_i32_3 : i32 to vector<96x1xi32>
    %19 = arith.cmpi sge, %0, %18 : vector<96x1xi32>
    %cst_4 = arith.constant 0.000000e+00 : f32
    %20 = vector.shape_cast %19 : vector<96x1xi1> to vector<96x1xi1>
    %21 = vector.broadcast %20 : vector<96x1xi1> to vector<96x128xi1>
    %22 = vector.broadcast %cst_4 : f32 to vector<96x128xf32>
    %23 = arith.select %21, %17, %22 : vector<96x128xi1>, vector<96x128xf32>
    %24 = arith.addf %16, %23 : vector<96x128xf32>
    %c4_i32 = arith.constant 4 : i32
    %25 = tpu.dynamic_rotate %24 by %c4_i32 dim 0 : vector<96x128xf32>, i32 -> vector<96x128xf32>
    %c4_i32_5 = arith.constant 4 : i32
    %26 = vector.broadcast %c4_i32_5 : i32 to vector<96x1xi32>
    %27 = arith.cmpi sge, %0, %26 : vector<96x1xi32>
    %cst_6 = arith.constant 0.000000e+00 : f32
    %28 = vector.shape_cast %27 : vector<96x1xi1> to vector<96x1xi1>
    %29 = vector.broadcast %28 : vector<96x1xi1> to vector<96x128xi1>
    %30 = vector.broadcast %cst_6 : f32 to vector<96x128xf32>
    %31 = arith.select %29, %25, %30 : vector<96x128xi1>, vector<96x128xf32>
    %32 = arith.addf %24, %31 : vector<96x128xf32>
    %c8_i32 = arith.constant 8 : i32
    %33 = tpu.dynamic_rotate %32 by %c8_i32 dim 0 : vector<96x128xf32>, i32 -> vector<96x128xf32>
    %c8_i32_7 = arith.constant 8 : i32
    %34 = vector.broadcast %c8_i32_7 : i32 to vector<96x1xi32>
    %35 = arith.cmpi sge, %0, %34 : vector<96x1xi32>
    %cst_8 = arith.constant 0.000000e+00 : f32
    %36 = vector.shape_cast %35 : vector<96x1xi1> to vector<96x1xi1>
    %37 = vector.broadcast %36 : vector<96x1xi1> to vector<96x128xi1>
    %38 = vector.broadcast %cst_8 : f32 to vector<96x128xf32>
    %39 = arith.select %37, %33, %38 : vector<96x128xi1>, vector<96x128xf32>
    %40 = arith.addf %32, %39 : vector<96x128xf32>
    %c16_i32 = arith.constant 16 : i32
    %41 = tpu.dynamic_rotate %40 by %c16_i32 dim 0 : vector<96x128xf32>, i32 -> vector<96x128xf32>
    %c16_i32_9 = arith.constant 16 : i32
    %42 = vector.broadcast %c16_i32_9 : i32 to vector<96x1xi32>
    %43 = arith.cmpi sge, %0, %42 : vector<96x1xi32>
    %cst_10 = arith.constant 0.000000e+00 : f32
    %44 = vector.shape_cast %43 : vector<96x1xi1> to vector<96x1xi1>
    %45 = vector.broadcast %44 : vector<96x1xi1> to vector<96x128xi1>
    %46 = vector.broadcast %cst_10 : f32 to vector<96x128xf32>
    %47 = arith.select %45, %41, %46 : vector<96x128xi1>, vector<96x128xf32>
    %48 = arith.addf %40, %47 : vector<96x128xf32>
    %c32_i32 = arith.constant 32 : i32
    %49 = tpu.dynamic_rotate %48 by %c32_i32 dim 0 : vector<96x128xf32>, i32 -> vector<96x128xf32>
    %c32_i32_11 = arith.constant 32 : i32
    %50 = vector.broadcast %c32_i32_11 : i32 to vector<96x1xi32>
    %51 = arith.cmpi sge, %0, %50 : vector<96x1xi32>
    %cst_12 = arith.constant 0.000000e+00 : f32
    %52 = vector.shape_cast %51 : vector<96x1xi1> to vector<96x1xi1>
    %53 = vector.broadcast %52 : vector<96x1xi1> to vector<96x128xi1>
    %54 = vector.broadcast %cst_12 : f32 to vector<96x128xf32>
    %55 = arith.select %53, %49, %54 : vector<96x128xi1>, vector<96x128xf32>
    %56 = arith.addf %48, %55 : vector<96x128xf32>
    %c64_i32 = arith.constant 64 : i32
    %57 = tpu.dynamic_rotate %56 by %c64_i32 dim 0 : vector<96x128xf32>, i32 -> vector<96x128xf32>
    %c64_i32_13 = arith.constant 64 : i32
    %58 = vector.broadcast %c64_i32_13 : i32 to vector<96x1xi32>
    %59 = arith.cmpi sge, %0, %58 : vector<96x1xi32>
    %cst_14 = arith.constant 0.000000e+00 : f32
    %60 = vector.shape_cast %59 : vector<96x1xi1> to vector<96x1xi1>
    %61 = vector.broadcast %60 : vector<96x1xi1> to vector<96x128xi1>
    %62 = vector.broadcast %cst_14 : f32 to vector<96x128xf32>
    %63 = arith.select %61, %57, %62 : vector<96x128xi1>, vector<96x128xf32>
    %64 = arith.addf %56, %63 : vector<96x128xf32>
    %65 = vector.extract_strided_slice %64 {offsets = [95, 0], sizes = [1, 128], strides = [1, 1]} : vector<96x128xf32> to vector<1x128xf32>
    %66 = vector.shape_cast %65 : vector<1x128xf32> to vector<1x128xf32>
    %67 = vector.broadcast %66 : vector<1x128xf32> to vector<96x128xf32>
    %c84_i32 = arith.constant 84 : i32
    %68 = tpu.dynamic_rotate %64 by %c84_i32 dim 0 : vector<96x128xf32>, i32 -> vector<96x128xf32>
    %c83_i32 = arith.constant 83 : i32
    %69 = vector.broadcast %c83_i32 : i32 to vector<96x1xi32>
    %70 = arith.cmpi sle, %0, %69 : vector<96x1xi32>
    %71 = vector.shape_cast %70 : vector<96x1xi1> to vector<96x1xi1>
    %72 = vector.broadcast %71 : vector<96x1xi1> to vector<96x128xi1>
    %73 = arith.select %72, %68, %67 : vector<96x128xi1>, vector<96x128xf32>
    %c13_i32 = arith.constant 13 : i32
    %74 = tpu.dynamic_rotate %64 by %c13_i32 dim 0 : vector<96x128xf32>, i32 -> vector<96x128xf32>
    %c13_i32_15 = arith.constant 13 : i32
    %75 = vector.broadcast %c13_i32_15 : i32 to vector<96x1xi32>
    %76 = arith.cmpi sge, %0, %75 : vector<96x1xi32>
    %cst_16 = arith.constant 0.000000e+00 : f32
    %77 = vector.shape_cast %76 : vector<96x1xi1> to vector<96x1xi1>
    %78 = vector.broadcast %77 : vector<96x1xi1> to vector<96x128xi1>
    %79 = vector.broadcast %cst_16 : f32 to vector<96x128xf32>
    %80 = arith.select %78, %74, %79 : vector<96x128xi1>, vector<96x128xf32>
    %81 = arith.subf %73, %80 : vector<96x128xf32>
    %c12_i32 = arith.constant 12 : i32
    %82 = vector.broadcast %c12_i32 : i32 to vector<96x1xi32>
    %83 = arith.subi %82, %0 : vector<96x1xi32>
    %c0_i32 = arith.constant 0 : i32
    %84 = vector.broadcast %c0_i32 : i32 to vector<96x1xi32>
    %85 = arith.maxsi %83, %84 : vector<96x1xi32>
    %86 = arith.sitofp %85 : vector<96x1xi32> to vector<96x1xf32>
    %c-83_i32 = arith.constant -83 : i32
    %87 = vector.broadcast %c-83_i32 : i32 to vector<96x1xi32>
    %88 = arith.addi %0, %87 : vector<96x1xi32>
    %c0_i32_17 = arith.constant 0 : i32
    %89 = vector.broadcast %c0_i32_17 : i32 to vector<96x1xi32>
    %90 = arith.maxsi %88, %89 : vector<96x1xi32>
    %91 = arith.sitofp %90 : vector<96x1xi32> to vector<96x1xf32>
    %92 = vector.broadcast %86 : vector<96x1xf32> to vector<96x128xf32>
    %93 = arith.mulf %92, %5 : vector<96x128xf32>
    %94 = arith.addf %81, %93 : vector<96x128xf32>
    %95 = vector.broadcast %91 : vector<96x1xf32> to vector<96x128xf32>
    %96 = arith.mulf %95, %8 : vector<96x128xf32>
    %97 = arith.addf %94, %96 : vector<96x128xf32>
    %cst_18 = arith.constant 4.000000e-02 : f32
    %98 = vector.broadcast %cst_18 : f32 to vector<96x128xf32>
    %99 = arith.mulf %97, %98 : vector<96x128xf32>
    %c0_19 = arith.constant 0 : index
    %c0_20 = arith.constant 0 : index
    %c0_21 = arith.constant 0 : index
    %100 = vector.load %arg2[%c0_19, %c0_20, %c0_21] : memref<1x96x128xf32, #tpu.memory_space<vmem>>, vector<1x96x128xf32>
    %101 = vector.shape_cast %100 : vector<1x96x128xf32> to vector<96x128xf32>
    %102 = vector.shape_cast %99 : vector<96x128xf32> to vector<1x96x128xf32>
    tpu.vector_store %arg2[%c0_19, %c0_20, %c0_21], %102 {strides = array<i32>} : memref<1x96x128xf32, #tpu.memory_space<vmem>>, vector<1x96x128xf32>,
    return
  }
  func.func @transform_0(%arg0: i32) -> (i32, i32, i32) {
    %c0_i32 = arith.constant 0 : i32
    %c0_i32_0 = arith.constant 0 : i32
    %c0_i32_1 = arith.constant 0 : i32
    return %arg0, %c0_i32, %c0_i32_0 : i32, i32, i32
  }
  func.func @transform_1(%arg0: i32) -> (i32, i32, i32) {
    %c0_i32 = arith.constant 0 : i32
    %c0_i32_0 = arith.constant 0 : i32
    %c0_i32_1 = arith.constant 0 : i32
    return %arg0, %c0_i32, %c0_i32_0 : i32, i32, i32
  }
}

</mosaic_0001>

<bundles_post_ra>
// kernel: tpu_custom_call.1
= control target key start
LH: loop header
LB: loop body
LE: loop exit
PB: predicated region body
PF: predicated region fallthrough
CT: control target
= control target key end

     0   :  { %6 = vsyncpa [#allocation3], 0  ;;  %s1729_s0 = inlined_call_operand.hbm [shape: f32[2,96,128], index: 0, kind: input, shape index: {}]   ;;  %s1730_s1 = inlined_call_operand.hbm [shape: f32[2,96,128], index: 1, kind: output, shape index: {}]  }
   0x1   :  { %8 = vsyncpa [#allocation3 + $0x1], 0 }
   0x2   :  { %9 = vsyncpa [#allocation4], 0 }
   0x3   :  { %11 = vsyncpa [#allocation4 + $0x1], 0  ;;  %s1259_s6 = smov 0   ;;  %s1261_s7 = smov 0  }
   0x4   :  { %s1263_s8 = smov 0   ;;  %s1265_s9 = smov 0  }
   0x5 LB: > { %s1280_s10 = sadd.s32 4294967295, %s1241_s9   ;;  %s1079_s11 = sadd.s32 4294967294, %s1241_s9   ;;  %s1241_s9 = sphi %s1265_s9, %s1742_s9   ;;  %s1237_s8 = sphi %s1263_s8, %s1741_s8   ;;  %s1233_s7 = sphi %s1261_s7, %s1740_s7   ;;  %s1229_s6 = sphi %s1259_s6, %s1739_s6  }
   0x6   : > { %s1284_s12 = sadd.s32 1, %s1241_s9   ;;  %s24_s13 = sadd.s32 1, %s1237_s8 }
   0x7   : > { %s21_s14 = ssub.s32 %s1241_s9, %s1284_s12  ;;  %p31_p0 = scmp.ne.s32.totalorder %s1237_s8, %s1233_s7 }
   0x8   : > { %p22_p1 = scmp.eq.s32.totalorder %s21_s14, 0  ;;  %p32_p2 = scmp.eq.s32.totalorder %s1241_s9, 0 }
   0x9   : > { %p37_p3 = scmp.ne.s32.totalorder %s1233_s7, %s1229_s6  ;;  %p38_p4 = scmp.eq.s32.totalorder %s1280_s10, 0 }
   0xa   : > { %s1296_s15 = scalar_select %p22_p1, %s1237_s8, %s24_s13  }
   0xb   : > { %p33_p5 = por %p32_p2, %p31_p0  ;;  %p1298_p6 = por %p38_p4, %p37_p3 }
   0xc   : > { %p61_p7 = scmp.eq.s32.totalorder %s1280_s10, 1  ;;  %p67_p8 = scmp.eq.s32.totalorder %s1079_s11, 1 }
   0xd   : > { %p1107_p10 = scmp.lt.s32.totalorder %s1241_s9, 2  ;;  %s87_s19 = sand.u32 1, %s1237_s8  }
   0xe   : > { %p1305_p11 = por %p61_p7, %p31_p0  ;;  %p1309_p12 = por %p67_p8, %p37_p3 }
   0xf   : > { %s1092_s20 = smul.u32 1536, %s1241_s9  ;;  %p1320_p13 = pnand %p1107_p10, %p33_p5 }
  0x10   : > { %s1733_s17 = scalar_select %p1305_p11, 1, 0 }
  0x11   : > { %s1734_s18 = scalar_select %p1309_p12, 1, 0 }
  0x12   : > { %s1091_s21 = smul.u32 96, %s87_s19  ;;  %s1318_s24 = scalar_lea.hbm %s1729_s0, %s1092_s20 }
  0x13   : > { %s1326_s28 = scalar_lea.sflag [#allocation3], %s87_s19  ;;  %s1145_s29 = scalar_lea.hbm %s1318_s24, 1536 }
  0x14   : > { %s91_s26 = scalar_lea.vmem [#allocation2], %s1091_s21  ;;  %p1146_p0 = scmp.ne.s32.totalorder %s1318_s24, %s1145_s29 }
  0x15   : > { %s98_s27 = sshll.u32 %s91_s26, 4  ;;  %p1147_p1 = pneg %p1320_p13  ;;  %s1324_s27 = int_to_ptr.vmem [resolvable:$true] %s98_s27 }
  0x16   : > { %s1150_s3 = scalar_lea.hbm %s1729_s0, 3072  ;;  %p1151_p4 = scmp.lt.u32.totalorder %s1318_s24, %s1729_s0 }
  0x17   : > { %p1148_p2 = pnand %p1147_p1, %p1146_p0  ;;  %p1152_p5 = scmp.lt.u32.totalorder %s1150_s3, %s1145_s29 }
  0x18   : > { %p1154_p8 = scmp.lt.u32.totalorder %s1145_s29, %s1318_s24 }
  0x19   : > { %p1149_p3 = pneg %p1148_p2  ;;  %p1153_p7 = por %p1152_p5, %p1151_p4 }
  0x1b   : > { %p1155_p10 = por %p1154_p8, %p1153_p7 }
  0x1d   : > { %p1156_p9 = pnand %p1155_p10, %p1149_p3 }
  0x1f   : > { %1159 = shalt.err (!%p1156_p9)
}
  0x20   : > { %s1160_s11 = scalar_lea.vmem %s1324_s27, 1536  ;;  %s1243_s13 = smov [#allocation2]  }
  0x21   : > { %p1161_p0 = scmp.ne.s32.totalorder %s1324_s27, %s1160_s11  ;;  %s1165_s14 = sshll.u32 %s1243_s13, 4  ;;  %s1166_s14 = int_to_ptr.vmem [resolvable:$false] %s1165_s14 }
  0x22   : > { %s1167_s19 = scalar_lea.vmem %s1166_s14, 3072  ;;  %p1168_p11 = scmp.lt.s32.totalorder %s1324_s27, %s1166_s14 }
  0x23   : > { %p1163_p2 = pnand %p1161_p0, %p1147_p1  ;;  %p1169_p4 = scmp.lt.s32.totalorder %s1167_s19, %s1160_s11 }
  0x25   : > { %p1164_p12 = pneg %p1163_p2  ;;  %p1170_p5 = por %p1169_p4, %p1168_p11 }
  0x27   : > { %p1171_p7 = pnand %p1170_p5, %p1164_p12 }
  0x29   : > { %1174 = shalt.err (!%p1171_p7)
}
  0x2a   : > { %s1244_s20 = smov 128   ;;  %s1245_s21 = smov 8  }
  0x2b   : > { %1102 = dma.hbm_to_vmem [thread:$0]  (!%p1320_p13), %s1318_s24, 1536, %s1324_s27, %s1326_s28, %s1244_s20, %s1244_s20, %s1245_s21  }
  0x2c   : > { %p1083_p9 = scmp.ge.s32.totalorder %s1241_s9, 1  ;;  %p106_p1 = scmp.lt.s32.totalorder %s1241_s9, 3 }
  0x2e   : > { %p107_p3 = pnand %p1083_p9, %p106_p1 }
  0x2f   : > { %s1357_s22 = sand.u32 (!%p107_p3), 1, %s1233_s7  }
  0x30   : > { %110 = sbr.rel (%p107_p3) target bundleno = 147 (0x93), region = 24  ;;  %s113_s26 = scalar_lea.sflag (!%p107_p3), [#allocation3], %s1357_s22 }
  0x31   : > { %s1093_s23 = smul.u32 (!%p107_p3), 96, %s1357_s22 }
  0x33   : > { %s1363_s29 = scalar_lea.vmem (!%p107_p3), [#allocation2], %s1093_s23 }
  0x37   : > { %1220 = dma.done.wait (%p1298_p6), %s113_s26, 1536  }
  0x38   : > { %1222 = vsyncadd (%p1298_p6), %s113_s26, 4294965760  ;;  %v135_v0 = vlaneseq  ;;  %v148_v5 = vld [vmem:[%s1363_s29] sm:$0xff]  ;;  %v149_v6 = vld [vmem:[%s1363_s29 + $0x8] sm:$0xff]  ;;  %s1553_s16 = scalar_lea.vmem [#allocation5], %s1093_s23  ;;  %s1094_s24 = smul.u32 1536, %s1280_s10 }
  0x39   : > { %v1380_v7 = vld [vmem:[%s1363_s29 + $0x10] sm:$0xff]  ;;  %v1390_v10 = vld [vmem:[%s1363_s29 + $0x48] sm:$0xff]  ;;  %v159_v12 = vld [vmem:[%s1363_s29 + $0x58] sm:$0xff]  ;;  %v168_v14 = vrot.slane %v148_v5, 7  ;;  %v169_v15 = vrot.slane %v149_v6, 7  ;;  %s1006_s25 = sshll.u32 %s1553_s16, 4  ;;  %s1677_s25 = int_to_ptr.vmem [resolvable:$true] %s1006_s25 }
  0x3a   : > { %v1369_v1 = vshrl.u32 %v135_v0, 7  ;;  %v158_v11 = vld [vmem:[%s1363_s29 + $0x50] sm:$0xff]  ;;  %v170_v16 = vrot.slane %v1380_v7, 7  ;;  %v177_v18 = vrot.slane %v1390_v10, 7  ;;  %v179_v20 = vrot.slane %v159_v12, 7  ;;  %v151_v29 = vld [vmem:[%s1363_s29 + $0x18] sm:$0xff]  ;;  %s1682_s10 = scalar_lea.hbm %s1730_s1, %s1094_s24 }
  0x3b   : > { %v178_v19 = vrot.slane %v158_v11, 7  ;;  %v152_v34 = vld [vmem:[%s1363_s29 + $0x20] sm:$0xff]  ;;  %v153_v35 = vld [vmem:[%s1363_s29 + $0x28] sm:$0xff]  ;;  %v154_v36 = vld [vmem:[%s1363_s29 + $0x30] sm:$0xff]  ;;  %v171_v46 = vrot.slane %v151_v29, 7  ;;  %s993_s30 = scalar_lea.sflag [#allocation4], %s1357_s22 }
  0x3c   : > { %v162_v2 = vsub.s32 0, %v1369_v1  ;;  %v166_v3 = vsub.s32 7, %v1369_v1  ;;  %vm180_vm0 = vcmp.lt.s32.totalorder %v1369_v1, 1  ;;  %vm193_vm1 = vcmp.ge.s32.totalorder %v1369_v1, 1  ;;  %v155_v41 = vld [vmem:[%s1363_s29 + $0x38] sm:$0xff]  ;;  %v156_v42 = vld [vmem:[%s1363_s29 + $0x40] sm:$0xff] }
  0x3d   : > { %vm265_vm2 = vcmp.lt.s32.totalorder %v1369_v1, 2  ;;  %v824_v4 = vsub.s32 12, %v1369_v1  ;;  %vm278_vm3 = vcmp.ge.s32.totalorder %v1369_v1, 2  ;;  %v1384_v8 = vadd.s32 8, %v1369_v1  ;;  %s1175_s2 = scalar_lea.vmem %s1677_s25, 1536  ;;  %p1736_p11 = scmp.ne.s32.totalorder %s1733_s17, 0 }
  0x3e   : > { %v1387_v9 = vadd.s32 80, %v1369_v1  ;;  %v1394_v13 = vrot.slane %v148_v5, %v162_v2  ;;  %v1399_v17 = vrot.slane %v159_v12, %v166_v3  ;;  %v190_v21 = vsel %vm180_vm0, %v169_v15, %v170_v16  ;;  %p1176_p6 = scmp.ne.s32.totalorder %s1677_s25, %s1175_s2  ;;  %s1246_s3 = smov [#allocation5]  }
  0x3f   : > { %v191_v22 = vsel %vm180_vm0, %v168_v14, %v169_v15  ;;  %v860_v23 = vcvt.s32.f32 %v824_v4  ;;  %v1407_v24 = vadd.s32 88, %v1369_v1  ;;  %v181_v25 = vsel %vm180_vm0, %v178_v19, %v179_v20  ;;  %s1179_s4 = sshll.u32 %s1246_s3, 4  ;;  %s1180_s4 = int_to_ptr.vmem [resolvable:$false] %s1179_s4 }
  0x40   : > { %v182_v26 = vsel %vm180_vm0, %v177_v18, %v178_v19  ;;  %v192_v27 = vsel %vm180_vm0, %v179_v20, %v168_v14  ;;  %v242_v28 = vadd.f32 %v191_v22, %v149_v6  ;;  %vm350_vm4 = vcmp.lt.s32.totalorder %v1369_v1, 4  ;;  %p1177_p12 = pnand %p1176_p6, %p1736_p11  ;;  %s1181_s5 = scalar_lea.vmem %s1180_s4, 3072 }
  0x41   : > { %v229_v30 = vsel %vm193_vm1, %v192_v27, 0.0  ;;  %v1420_v31 = vadd.f32 %v190_v21, %v1380_v7  ;;  %v1422_v32 = vadd.f32 %v182_v26, %v158_v11  ;;  %v252_v33 = vadd.f32 %v181_v25, %v159_v12  ;;  %p1182_p8 = scmp.lt.s32.totalorder %s1677_s25, %s1180_s4  ;;  %p1183_p10 = scmp.lt.s32.totalorder %s1181_s5, %s1175_s2 }
  0x42   : > { %v241_v37 = vadd.f32 %v229_v30, %v148_v5  ;;  %v254_v38 = vrot.slane %v242_v28, 6  ;;  %vm363_vm5 = vcmp.ge.s32.totalorder %v1369_v1, 4  ;;  %v1429_v39 = vmul.f32 %v860_v23, %v1394_v13  ;;  %p1178_p13 = pneg %p1177_p12 }
  0x43   : > { %v1432_v40 = vmul.f32 0.0, %v1399_v17  ;;  %v255_v43 = vrot.slane %v1420_v31, 6  ;;  %v263_v44 = vrot.slane %v1422_v32, 6  ;;  %v264_v45 = vrot.slane %v252_v33, 6  ;;  %p1184_p0 = por %p1183_p10, %p1182_p8 }
  0x44   : > { %v253_v47 = vrot.slane %v241_v37, 6  ;;  %v172_v48 = vrot.slane %v152_v34, 7  ;;  %v173_v49 = vrot.slane %v153_v35, 7  ;;  %v174_v50 = vrot.slane %v154_v36, 7 }
  0x45   : > { %v266_v51 = vsel %vm265_vm2, %v263_v44, %v264_v45  ;;  %v275_v52 = vsel %vm265_vm2, %v254_v38, %v255_v43  ;;  %v175_v53 = vrot.slane %v155_v41, 7  ;;  %v176_v54 = vrot.slane %v156_v42, 7  ;;  %p1185_p2 = pnand %p1184_p0, %p1178_p13 }
  0x46   : > { %v276_v55 = vsel %vm265_vm2, %v253_v47, %v254_v38  ;;  %v277_v56 = vsel %vm265_vm2, %v264_v45, %v253_v47  ;;  %v1449_v57 = vadd.f32 %v275_v52, %v1420_v31  ;;  %v1451_v58 = vadd.f32 %v266_v51, %v252_v33 }
  0x47   : > { %v314_v59 = vsel %vm278_vm3, %v277_v56, 0.0  ;;  %v327_v60 = vadd.f32 %v276_v55, %v242_v28  ;;  %v183_v61 = vsel %vm180_vm0, %v176_v54, %v177_v18  ;;  %v184_v62 = vsel %vm180_vm0, %v175_v53, %v176_v54 }
  0x48   : > { %v326_v63 = vadd.f32 %v314_v59, %v241_v37  ;;  %v340_v0 = vrot.slane %v1449_v57, 4  ;;  %v349_v2 = vrot.slane %v1451_v58, 4  ;;  %v185_v4 = vsel %vm180_vm0, %v174_v50, %v175_v53 }
  0x49   : > { %v339_v5 = vrot.slane %v327_v60, 4  ;;  %v186_v6 = vsel %vm180_vm0, %v173_v49, %v174_v50  ;;  %v187_v7 = vsel %vm180_vm0, %v172_v48, %v173_v49  ;;  %v188_v11 = vsel %vm180_vm0, %v171_v46, %v172_v48 }
  0x4a   : > { %v338_v12 = vrot.slane %v326_v63, 4  ;;  %v189_v14 = vsel %vm180_vm0, %v170_v16, %v171_v46  ;;  %v245_v15 = vadd.f32 %v188_v11, %v152_v34  ;;  %v246_v18 = vadd.f32 %v187_v7, %v153_v35 }
  0x4b   : > { %v360_v19 = vsel %vm350_vm4, %v339_v5, %v340_v0  ;;  %v244_v20 = vadd.f32 %v189_v14, %v151_v29  ;;  %v247_v21 = vadd.f32 %v186_v6, %v154_v36  ;;  %v248_v22 = vadd.f32 %v185_v4, %v155_v41 }
  0x4c   : > { %v361_v23 = vsel %vm350_vm4, %v338_v12, %v339_v5  ;;  %v362_v25 = vsel %vm350_vm4, %v349_v2, %v338_v12  ;;  %v1482_v16 = vadd.f32 %v360_v19, %v1449_v57  ;;  %v249_v26 = vadd.f32 %v184_v62, %v156_v42 }
  0x4d   : > { %v399_v27 = vsel %vm363_vm5, %v362_v25, 0.0  ;;  %v412_v28 = vadd.f32 %v361_v23, %v327_v60  ;;  %v250_v29 = vadd.f32 %v183_v61, %v1390_v10  ;;  %v256_v30 = vrot.slane %v244_v20, 6 }
  0x4e   : > { %v1487_v33 = vadd.f32 %v399_v27, %v326_v63  ;;  %v257_v34 = vrot.slane %v245_v15, 6  ;;  %v258_v35 = vrot.slane %v246_v18, 6  ;;  %v259_v36 = vrot.slane %v247_v21, 6 }
  0x4f   : > { %v1490_v37 = vadd.f32 %v1482_v16, %v412_v28  ;;  %v260_v38 = vrot.slane %v248_v22, 6  ;;  %v261_v41 = vrot.slane %v249_v26, 6  ;;  %v262_v45 = vrot.slane %v250_v29, 6 }
  0x50   : > { %v1493_v42 = vadd.f32 %v412_v28, %v1487_v33  ;;  %v271_v46 = vsel %vm265_vm2, %v258_v35, %v259_v36  ;;  %v272_v10 = vsel %vm265_vm2, %v257_v34, %v258_v35  ;;  %v273_v47 = vsel %vm265_vm2, %v256_v30, %v257_v34 }
  0x51   : > { %v1503_v48 = vadd.f32 %v1490_v37, %v1487_v33  ;;  %v267_v49 = vsel %vm265_vm2, %v262_v45, %v263_v44  ;;  %v268_v50 = vsel %vm265_vm2, %v261_v41, %v262_v45  ;;  %v269_v51 = vsel %vm265_vm2, %v260_v38, %v261_v41 }
  0x52   : > { %v668_v52 = vrot.slane %v1493_v42, 4  ;;  %v270_v53 = vsel %vm265_vm2, %v259_v36, %v260_v38  ;;  %v274_v54 = vsel %vm265_vm2, %v255_v43, %v256_v30  ;;  %v330_v55 = vadd.f32 %v273_v47, %v245_v15 }
  0x53   : > { %v669_v56 = vrot.slane %v1503_v48, 4  ;;  %v329_v44 = vadd.f32 %v274_v54, %v244_v20  ;;  %v331_v59 = vadd.f32 %v272_v10, %v246_v18  ;;  %v332_v60 = vadd.f32 %v271_v46, %v247_v21 }
  0x54   : > { %v333_v61 = vadd.f32 %v270_v53, %v248_v22  ;;  %v334_v62 = vadd.f32 %v269_v51, %v249_v26  ;;  %v335_v63 = vadd.f32 %v268_v50, %v250_v29  ;;  %v336_v4 = vadd.f32 %v267_v49, %v1422_v32 }
  0x55   : > { %v688_v5 = vsel %vm350_vm4, %v668_v52, %v669_v56  ;;  %v341_v31 = vrot.slane %v329_v44, 4  ;;  %v342_v6 = vrot.slane %v330_v55, 4  ;;  %v343_v7 = vrot.slane %v331_v59, 4 }
  0x56   : > { %v932_v43 = vadd.f32 %v1429_v39, %v688_v5  ;;  %v344_v11 = vrot.slane %v332_v60, 4  ;;  %v345_v12 = vrot.slane %v333_v61, 4  ;;  %v346_v14 = vrot.slane %v334_v62, 4 }
  0x57   : > { %vm751_vm6 = vcmp.lt.s32.totalorder %v1369_v1, 5  ;;  %v347_v15 = vrot.slane %v335_v63, 4  ;;  %v348_v18 = vrot.slane %v336_v4, 4  ;;  %v357_v32 = vsel %vm350_vm4, %v342_v6, %v343_v7 }
  0x58   : > { %v358_v19 = vsel %vm350_vm4, %v341_v31, %v342_v6  ;;  %v956_v20 = vadd.f32 %v1432_v40, %v932_v43  ;;  %v354_v21 = vsel %vm350_vm4, %v345_v12, %v346_v14  ;;  %v355_v39 = vsel %vm350_vm4, %v344_v11, %v345_v12 }
  0x59   : > { %v356_v22 = vsel %vm350_vm4, %v343_v7, %v344_v11  ;;  %v351_v23 = vsel %vm350_vm4, %v348_v18, %v349_v2  ;;  %v352_v25 = vsel %vm350_vm4, %v347_v15, %v348_v18  ;;  %v353_v26 = vsel %vm350_vm4, %v346_v14, %v347_v15 }
  0x5a   : > { %v359_v27 = vsel %vm350_vm4, %v340_v0, %v341_v31  ;;  %v968_v28 = vmul.f32 0.04, %v956_v20  ;;  %v415_v30 = vadd.f32 %v358_v19, %v330_v55  ;;  %v416_v34 = vadd.f32 %v357_v32, %v331_v59 }
  0x5b   : > { %v414_v29 = vadd.f32 %v359_v27, %v329_v44  ;;  %v417_v35 = vadd.f32 %v356_v22, %v332_v60  ;;  %v418_v36 = vadd.f32 %v355_v39, %v333_v61  ;;  %v419_v38 = vadd.f32 %v354_v21, %v334_v62 }
  0x5c   : > { %v1549_v41 = vadd.f32 %v353_v26, %v335_v63  ;;  %980 = vst [vmem:[%s1553_s16] sm:$0xff] %v968_v28  ;;  %v1556_v2 = vadd.f32 %v352_v25, %v336_v4  ;;  %v422_v57 = vadd.f32 %v351_v23, %v1451_v58  ;;  %v476_v45 = vadd.f32 %v416_v34, %v415_v30 }
  0x5d   : > { %v474_v0 = vadd.f32 %v414_v29, %v1482_v16  ;;  %v1561_v46 = vmul.f32 0.0, %v1394_v13  ;;  %v478_v10 = vadd.f32 %v418_v36, %v417_v35  ;;  %v739_v49 = vrot.slane %v1487_v33, 3 }
  0x5e   : > { %v480_v47 = vadd.f32 %v1549_v41, %v419_v38  ;;  %v482_v50 = vadd.f32 %v422_v57, %v1556_v2  ;;  %vm765_vm7 = vcmp.ge.s32.totalorder %v1384_v8, 13  ;;  %v825_v52 = vsub.s32 12, %v1384_v8 }
  0x5f   : > { %v534_v51 = vadd.f32 %v474_v0, %v1493_v42  ;;  %v475_v58 = vadd.f32 %v415_v30, %v414_v29  ;;  %v538_v53 = vadd.f32 %v478_v10, %v476_v45  ;;  %v740_v16 = vrot.slane %v1493_v42, 3 }
  0x60   : > { %v536_v54 = vadd.f32 %v476_v45, %v474_v0  ;;  %v741_v55 = vrot.slane %v1503_v48, 3  ;;  %v542_v44 = vadd.f32 %v482_v50, %v480_v47  ;;  %vm838_vm8 = vcmp.gt.s32.totalorder %v825_v52, 0 }
  0x61   : > { %v670_v59 = vrot.slane %v534_v51, 4  ;;  %v1084_v60 = vcvt.s32.f32 %v825_v52  ;;  %v535_v61 = vadd.f32 %v475_v58, %v1490_v37  ;;  %v762_v62 = vsel %vm751_vm6, %v739_v49, %v740_v16 }
  0x62   : > { %v596_v63 = vadd.f32 %v536_v54, %v1493_v42  ;;  %v761_v4 = vsel %vm751_vm6, %v740_v16, %v741_v55  ;;  %v602_v5 = vadd.f32 %v542_v44, %v538_v53  ;;  %v477_v7 = vadd.f32 %v417_v35, %v416_v34 }
  0x63   : > { %v687_v31 = vsel %vm350_vm4, %v669_v56, %v670_v59  ;;  %v1085_v6 = vsel %vm838_vm8, %v1084_v60, 0.0  ;;  %v595_v37 = vadd.f32 %v535_v61, %v1487_v33  ;;  %v742_v12 = vrot.slane %v534_v51, 3 }
  0x64   : > { %v921_v43 = vmul.f32 %v1085_v6, %v1394_v13  ;;  %v672_v11 = vrot.slane %v596_v63, 4  ;;  %v1583_v14 = vadd.f32 %v602_v5, %v534_v51  ;;  %v1585_v15 = vadd.f32 %v477_v7, %v475_v58 }
  0x65   : > { %v1587_v18 = vadd.f32 %v538_v53, %v534_v51  ;;  %v479_v32 = vadd.f32 %v419_v38, %v418_v36  ;;  %v671_v19 = vrot.slane %v595_v37, 4  ;;  %v760_v20 = vsel %vm751_vm6, %v741_v55, %v742_v12 }
  0x66   : > { %v743_v56 = vrot.slane %v595_v37, 3  ;;  %v744_v21 = vrot.slane %v596_v63, 3  ;;  %v750_v39 = vrot.slane %v1583_v14, 3  ;;  %v597_v13 = vadd.f32 %v1585_v15, %v1503_v48 }
  0x67   : > { %v674_v22 = vrot.slane %v1587_v18, 4  ;;  %v539_v23 = vadd.f32 %v479_v32, %v477_v7  ;;  %v686_v25 = vsel %vm350_vm4, %v670_v59, %v671_v19  ;;  %v685_v26 = vsel %vm350_vm4, %v671_v19, %v672_v11 }
  0x68   : > { %v759_v27 = vsel %vm751_vm6, %v742_v12, %v743_v56  ;;  %v758_v28 = vsel %vm751_vm6, %v743_v56, %v744_v21  ;;  %v763_v29 = vsel %vm751_vm6, %v750_v39, %v739_v49  ;;  %v814_v30 = vsub.f32 %v686_v25, %v762_v62 }
  0x69   : > { %v815_v34 = vsub.f32 %v685_v26, %v761_v4  ;;  %v673_v35 = vrot.slane %v597_v13, 4  ;;  %v801_v36 = vsel %vm765_vm7, %v763_v29, 0.0  ;;  %v599_v38 = vadd.f32 %v539_v23, %v535_v61 }
  0x6a   : > { %v540_v57 = vadd.f32 %v480_v47, %v478_v10  ;;  %v745_v0 = vrot.slane %v597_v13, 3  ;;  %v813_v45 = vsub.f32 %v687_v31, %v801_v36  ;;  %v934_v50 = vadd.f32 %v1561_v46, %v814_v30 }
  0x6b   : > { %v935_v51 = vadd.f32 %v1561_v46, %v815_v34  ;;  %v684_v52 = vsel %vm350_vm4, %v672_v11, %v673_v35  ;;  %v683_v49 = vsel %vm350_vm4, %v673_v35, %v674_v22  ;;  %v659_v53 = vadd.f32 %v599_v38, %v1487_v33 }
  0x6c   : > { %v816_v58 = vsub.f32 %v684_v52, %v760_v20  ;;  %v600_v16 = vadd.f32 %v540_v57, %v536_v54  ;;  %v933_v8 = vadd.f32 %v921_v43, %v813_v45  ;;  %v958_v55 = vadd.f32 %v1432_v40, %v934_v50 }
  0x6d   : > { %v959_v10 = vadd.f32 %v1432_v40, %v935_v51  ;;  %v817_v47 = vsub.f32 %v683_v49, %v759_v27  ;;  %v675_v59 = vrot.slane %v659_v53, 4  ;;  %v757_v61 = vsel %vm751_vm6, %v744_v21, %v745_v0 }
  0x6e   : > { %v936_v44 = vadd.f32 %v1561_v46, %v816_v58  ;;  %v660_v60 = vadd.f32 %v600_v16, %v1493_v42  ;;  %v957_v62 = vadd.f32 %v1432_v40, %v933_v8  ;;  %v970_v63 = vmul.f32 0.04, %v958_v55 }
  0x6f   : > { %v971_v54 = vmul.f32 0.04, %v959_v10  ;;  %v937_v4 = vadd.f32 %v1561_v46, %v817_v47  ;;  %v682_v31 = vsel %vm350_vm4, %v674_v22, %v675_v59  ;;  %v481_v7 = vadd.f32 %v1556_v2, %v1549_v41 }
  0x70   : > { %v960_v5 = vadd.f32 %v1432_v40, %v936_v44  ;;  %v676_v6 = vrot.slane %v660_v60, 4  ;;  %v969_v42 = vmul.f32 0.04, %v957_v62  ;;  %982 = vst [vmem:[%s1553_s16 + $0x10] sm:$0xff] %v970_v63  ;;  %v818_v37 = vsub.f32 %v682_v31, %v758_v28 }
  0x71   : > { %983 = vst [vmem:[%s1553_s16 + $0x18] sm:$0xff] %v971_v54  ;;  %v961_v43 = vadd.f32 %v1432_v40, %v937_v4  ;;  %v746_v11 = vrot.slane %v1587_v18, 3  ;;  %v541_v20 = vadd.f32 %v481_v7, %v479_v32  ;;  %v678_v56 = vrot.slane %v1583_v14, 4 }
  0x72   : > { %v972_v12 = vmul.f32 0.04, %v960_v5  ;;  %v681_v19 = vsel %vm350_vm4, %v675_v59, %v676_v6  ;;  %981 = vst [vmem:[%s1553_s16 + $0x8] sm:$0xff] %v969_v42  ;;  %v938_v41 = vadd.f32 %v1561_v46, %v818_v37  ;;  %v747_v22 = vrot.slane %v659_v53, 3 }
  0x73   : > { %v973_v21 = vmul.f32 0.04, %v961_v43  ;;  %v819_v2 = vsub.f32 %v681_v19, %v757_v61  ;;  %v756_v39 = vsel %vm751_vm6, %v745_v0, %v746_v11  ;;  %v601_v13 = vadd.f32 %v541_v20, %v1585_v15 }
  0x74   : > { %984 = vst [vmem:[%s1553_s16 + $0x20] sm:$0xff] %v972_v12  ;;  %v666_v18 = vrot.slane %v1583_v14, %v166_v3  ;;  %v667_v32 = vrot.slane %v1487_v33, 4  ;;  %v962_v23 = vadd.f32 %v1432_v40, %v938_v41  ;;  %vm701_vm9 = vcmp.le.s32.totalorder %v1387_v9, 83 }
  0x75   : > { %985 = vst [vmem:[%s1553_s16 + $0x28] sm:$0xff] %v973_v21  ;;  %v939_v25 = vadd.f32 %v1561_v46, %v819_v2  ;;  %v748_v26 = vrot.slane %v660_v60, 3  ;;  %v661_v27 = vadd.f32 %v601_v13, %v1503_v48  ;;  %v755_v15 = vsel %vm751_vm6, %v746_v11, %v747_v22 }
  0x76   : > { %v690_v28 = vsel %vm350_vm4, %v678_v56, %v667_v32  ;;  %v882_v3 = vadd.s32 4294967213, %v1387_v9  ;;  %v974_v33 = vmul.f32 0.04, %v962_v23  ;;  %v883_v57 = vadd.s32 4294967213, %v1407_v24 }
  0x77   : > { %v963_v14 = vadd.f32 %v1432_v40, %v939_v25  ;;  %v737_v29 = vsel %vm701_vm9, %v690_v28, %v666_v18  ;;  %v754_v30 = vsel %vm751_vm6, %v747_v22, %v748_v26  ;;  %v677_v34 = vrot.slane %v661_v27, 4 }
  0x78   : > { %v822_v35 = vsub.f32 %v737_v29, %v754_v30  ;;  %vm904_vm10 = vcmp.gt.s32.totalorder %v882_v3, 0  ;;  %v1086_v48 = vcvt.s32.f32 %v882_v3  ;;  %986 = vst [vmem:[%s1553_s16 + $0x30] sm:$0xff] %v974_v33  ;;  %v749_v38 = vrot.slane %v661_v27, 3 }
  0x79   : > { %v975_v36 = vmul.f32 0.04, %v963_v14  ;;  %v680_v9 = vsel %vm350_vm4, %v676_v6, %v677_v34  ;;  %v679_v0 = vsel %vm350_vm4, %v677_v34, %v678_v56  ;;  %v919_v53 = vcvt.s32.f32 %v883_v57 }
  0x7a   : > { %v1087_v45 = vsel %vm904_vm10, %v1086_v48, 0.0  ;;  %v942_v50 = vadd.f32 %v1561_v46, %v822_v35  ;;  %v820_v51 = vsub.f32 %v680_v9, %v756_v39  ;;  %v821_v52 = vsub.f32 %v679_v0, %v755_v15 }
  0x7b   : > { %987 = vst [vmem:[%s1553_s16 + $0x38] sm:$0xff] %v975_v36  ;;  %v954_v58 = vmul.f32 %v1087_v45, %v1399_v17  ;;  %v753_v49 = vsel %vm751_vm6, %v748_v26, %v749_v38  ;;  %v955_v47 = vmul.f32 %v919_v53, %v1399_v17 }
  0x7c   : > { %v823_v24 = vsub.f32 %v666_v18, %v753_v49  ;;  %v940_v16 = vadd.f32 %v1561_v46, %v820_v51  ;;  %v941_v8 = vadd.f32 %v1561_v46, %v821_v52 }
  0x7d   : > { %v966_v55 = vadd.f32 %v954_v58, %v942_v50 }
  0x7e   : > { %v943_v10 = vadd.f32 %v1561_v46, %v823_v24  ;;  %v964_v1 = vadd.f32 %v1432_v40, %v940_v16  ;;  %v965_v44 = vadd.f32 %v1432_v40, %v941_v8 }
  0x7f   : > { %v978_v59 = vmul.f32 0.04, %v966_v55 }
  0x80   : > { %v967_v60 = vadd.f32 %v955_v47, %v943_v10  ;;  %v976_v61 = vmul.f32 0.04, %v964_v1  ;;  %v977_v62 = vmul.f32 0.04, %v965_v44 }
  0x81   : > { %990 = vst [vmem:[%s1553_s16 + $0x50] sm:$0xff] %v978_v59 }
  0x82   : > { %v979_v46 = vmul.f32 0.04, %v967_v60  ;;  %988 = vst [vmem:[%s1553_s16 + $0x40] sm:$0xff] %v976_v61  ;;  %989 = vst [vmem:[%s1553_s16 + $0x48] sm:$0xff] %v977_v62 }
  0x84   : > { %991 = vst [vmem:[%s1553_s16 + $0x58] sm:$0xff] %v979_v46 }
  0x85   : > { %1188 = shalt.err (!%p1185_p2)
}
  0x86   : > { %s1189_s11 = scalar_lea.hbm %s1682_s10, 1536  ;;  %s1193_s19 = scalar_lea.hbm %s1730_s1, 3072 }
  0x87   : > { %p1190_p4 = scmp.ne.s32.totalorder %s1682_s10, %s1189_s11  ;;  %p1194_p9 = scmp.lt.u32.totalorder %s1682_s10, %s1730_s1 }
  0x88   : > { %p1195_p1 = scmp.lt.u32.totalorder %s1193_s19, %s1189_s11  ;;  %p1197_p6 = scmp.lt.u32.totalorder %s1189_s11, %s1682_s10 }
  0x89   : > { %p1191_p5 = pnand %p1190_p4, %p1736_p11 }
  0x8a   : > { %p1196_p3 = por %p1195_p1, %p1194_p9 }
  0x8b   : > { %p1192_p7 = pneg %p1191_p5 }
  0x8c   : > { %p1198_p12 = por %p1197_p6, %p1196_p3 }
  0x8e   : > { %p1199_p13 = pnand %p1198_p12, %p1192_p7 }
  0x90   : > { %1202 = shalt.err (!%p1199_p13)
}
  0x91   : > { %s1247_s23 = smov 128   ;;  %s1248_s26 = smov 8  }
  0x92   : > { %1097 = dma.vmem_to_hbm [thread:$0]  (%p1736_p11), %s1677_s25, 1536, %s1682_s10, %s993_s30, %s1247_s23, %s1247_s23, %s1248_s26  }
  0x93 PF: > { %s1021_s29 = sand.u32 1, %s1229_s6   ;;  %p1737_p8 = scmp.ne.s32.totalorder %s1734_s18, 0 }
  0x94   : > { %p1738_p10 = scmp.ge.s32.totalorder %s1241_s9, 2  ;;  %s1022_s16 = scalar_lea.sflag [#allocation4], %s1021_s29 }
  0x96   : > { %p1104_p0 = pnand %p1738_p10, %p1737_p8 }
  0x98   : > { %1224 = dma.done.wait (!%p1104_p0), %s1022_s16, 1536  }
  0x99   : > { %1226 = vsyncadd (!%p1104_p0), %s1022_s16, 4294965760  ;;  %p14_p2 = scmp.ge.s32.totalorder %s1284_s12, 4   ;;  %s1739_s6 = smov %s1233_s7 }
  0x9a   : > { %s1740_s7 = smov %s1237_s8  ;;  %s1741_s8 = smov %s1296_s15 }
  0x9b   : > { %s1742_s9 = smov %s1284_s12  ;;  %16 = sbr.rel (!%p14_p2) target bundleno = 5 (0x5), region = 69 }
  0xa2   :  { %1027 = vsyncpa [#allocation3], 1 }
  0xa3   :  { %1029 = vsyncpa [#allocation3 + $0x1], 1 }
  0xa4   :  { %1030 = vsyncpa [#allocation4], 1 }
  0xa5   :  { %1032 = vsyncpa [#allocation4 + $0x1], 1 }

</bundles_post_ra>
